<compile_context>
chip_gen: v5e
topology: v5e:2x2
jax: 0.10.0
libtpu: 0.0.40
codegen_flags: <defaults>
</compile_context>

<pallas_src>
import jax
import jax.numpy as jnp
from jax.experimental import pallas as pl
from jax.experimental.pallas import tpu as pltpu

IN_DIM = 28 ** 2  # 784
H_DIM = 4
OUT_DIM = 1


def _round_up(n, m):
    return ((n + m - 1) // m) * m


def mlp_kernel(x_ref, w1_ref, p_ref, o_ref):
    # ---- Layer 1: (TM, 784) bf16 @ (784, 4) bf16 -> f32 accumulate on the MXU ----
    h1 = jnp.dot(x_ref[...], w1_ref[...], preferred_element_type=jnp.float32)

    # Unpack the small parameters from the single packed (8, 8) f32 tile.
    p = p_ref[...]
    b1 = p[0:1, 0:4]      # (1, 4)
    w2 = p[1:5, 0:4]      # (4, 4)  stored (in, out)
    b2 = p[5:6, 0:4]      # (1, 4)
    w3r = p[6:7, 0:4]     # (1, 4)  == w3.T
    b3 = p[7:8, 0:1]      # (1, 1)

    h1 = jax.nn.sigmoid(h1 + b1)                      # (TM, 4), f32

    # ---- Layer 2 on the VPU: unrolled 4-term multiply-add, no MXU push/pop ----
    acc2 = h1[:, 0:1] * w2[0:1, :]
    for k in range(1, H_DIM):
        acc2 = acc2 + h1[:, k:k + 1] * w2[k:k + 1, :]
    h2 = jax.nn.sigmoid(acc2 + b2)                    # (TM, 4), f32

    # ---- Layer 3 on the VPU: (TM, 4) . (4,) -> (TM, 1) ----
    acc3 = h2[:, 0:1] * w3r[0:1, 0:1]
    for k in range(1, H_DIM):
        acc3 = acc3 + h2[:, k:k + 1] * w3r[0:1, k:k + 1]
    # TODO(synk): (TM, 1) output uses lane-masked stores; a lane-dense (1, B) layout would be
    # marginally faster but changes the module's (B, 1) output contract, so keep (B, 1).
    o_ref[...] = jax.nn.sigmoid(acc3 + b3).astype(o_ref.dtype)


def pack_small_params(b1, w2, b2, w3, b3):
    """Pack b1, w2, b2, w3, b3 (29 floats) into one (8, 8) f32 array -> a single VMEM tile."""
    packed = jnp.zeros((8, 8), jnp.float32)
    packed = packed.at[0, 0:4].set(b1.reshape(4))
    packed = packed.at[1:5, 0:4].set(w2.reshape(4, 4))
    packed = packed.at[5, 0:4].set(b2.reshape(4))
    packed = packed.at[6, 0:4].set(w3.reshape(4))
    packed = packed.at[7, 0].set(b3.reshape(())[()])
    return packed


def neural_net_forward(x, w1, b1, w2, b2, w3, b3, *, tm=None):
    """x: (B, 784) float32. Returns (B, 1) float32 = sigmoid(L3(sigmoid(L2(sigmoid(L1(x))))))."""
    B, F = x.shape
    assert F == IN_DIM

    if tm is None:
        tm = min(1024, _round_up(B, 8))          # tile sized for v7x's smaller VMEM
    tm = _round_up(tm, 8)

    padded_b = _round_up(B, tm)
    if padded_b != B:
        x = jnp.pad(x, ((0, padded_b - B), (0, 0)))

    # bf16 halves HBM traffic on the dominant DMA (x) and is native MXU precision.
    x_bf16 = x.astype(jnp.bfloat16)
    w1_bf16 = w1.astype(jnp.bfloat16)
    packed = pack_small_params(b1, w2, b2, w3, b3)

    grid = (padded_b // tm,)

    out = pl.pallas_call(
        mlp_kernel,
        out_shape=jax.ShapeDtypeStruct((padded_b, OUT_DIM), jnp.float32),
        grid_spec=pltpu.PrefetchScalarGridSpec(
            num_scalar_prefetch=0,
            grid=grid,
            in_specs=[
                pl.BlockSpec((tm, IN_DIM), lambda i: (i, 0)),      # x tile, pipelined
                pl.BlockSpec((IN_DIM, H_DIM), lambda i: (0, 0)),   # w1, VMEM-resident
                pl.BlockSpec((8, 8), lambda i: (0, 0)),            # packed small params
            ],
            out_specs=pl.BlockSpec((tm, OUT_DIM), lambda i: (i, 0)),
        ),
        compiler_params=pltpu.CompilerParams(
            dimension_semantics=("parallel",),                     # megacore on v7x
        ),
        cost_estimate=pl.CostEstimate(
            flops=2 * padded_b * (IN_DIM * H_DIM + H_DIM * H_DIM + H_DIM * OUT_DIM),
            transcendentals=padded_b * (H_DIM + H_DIM + OUT_DIM),
            bytes_accessed=(x_bf16.size * 2 + w1_bf16.size * 2
                            + packed.size * 4 + padded_b * OUT_DIM * 4),
        ),
    )(x_bf16, w1_bf16, packed)

    return out[:B]


def init_params(key):
    # Deterministic init mimicking PyTorch Linear default: U(-1/sqrt(fan_in), 1/sqrt(fan_in)).
    k = jax.random.split(key, 6)

    def linear(kw, kb, fan_in, fan_out):
        bound = 1.0 / jnp.sqrt(fan_in)
        w = jax.random.uniform(kw, (fan_in, fan_out), jnp.float32, -bound, bound)  # (in, out)
        b = jax.random.uniform(kb, (1, fan_out), jnp.float32, -bound, bound)
        return w, b

    w1, b1 = linear(k[0], k[1], IN_DIM, H_DIM)
    w2, b2 = linear(k[2], k[3], H_DIM, H_DIM)
    w3, b3 = linear(k[4], k[5], H_DIM, OUT_DIM)
    return w1, b1, w2, b2, w3, b3


def reference_forward(x, w1, b1, w2, b2, w3, b3):
    # Matches kernel numerics: first matmul with bf16 operands, f32 accumulation; rest in f32.
    xb = x.astype(jnp.bfloat16).astype(jnp.float32)
    w1b = w1.astype(jnp.bfloat16).astype(jnp.float32)
    h1 = jax.nn.sigmoid(xb @ w1b + b1)
    h2 = jax.nn.sigmoid(h1 @ w2 + b2)
    return jax.nn.sigmoid(h2 @ w3 + b3)


if __name__ == "__main__":
    key = jax.random.PRNGKey(0)
    k_x, k_p = jax.random.split(key)
    params = init_params(k_p)

    # Small demo batch (single grid step).
    B = 8
    x = jax.random.normal(k_x, (B, IN_DIM), jnp.float32)
    out = jax.block_until_ready(neural_net_forward(x, *params))
    ref = reference_forward(x, *params)
    assert out.shape == (B, OUT_DIM)
    assert jnp.allclose(out, ref, atol=1e-4, rtol=1e-4), "mismatch (B=8)"

    # Exercise the gridded/pipelined path + batch padding: B=20 with TM=8 -> grid of 3.
    B2 = 20
    x2 = jax.random.normal(jax.random.PRNGKey(1), (B2, IN_DIM), jnp.float32)
    out2 = jax.block_until_ready(neural_net_forward(x2, *params, tm=8))
    ref2 = reference_forward(x2, *params)
    assert out2.shape == (B2, OUT_DIM)
    assert jnp.allclose(out2, ref2, atol=1e-4, rtol=1e-4), "mismatch (B=20, gridded)"

    print("KERNEL_OK")
</pallas_src>

<mosaic_0001>
module attributes {stable_mosaic.version = 11 : i64} {
  func.func @mlp_kernel(%arg0: i32, %arg1: memref<8x784xbf16, #tpu.memory_space<vmem>>, %arg2: memref<784x4xbf16, #tpu.memory_space<vmem>>, %arg3: memref<8x8xf32, #tpu.memory_space<vmem>>, %arg4: memref<8x1xf32, #tpu.memory_space<vmem>>) attributes {dimension_semantics = [#tpu.dimension_semantics<parallel>], iteration_bounds = array<i64: 1>, scalar_prefetch = 0 : i64, scratch_operands = 0 : i64, tpu.core_type = #tpu.core_type<tc>, window_params = [{transform_indices = @transform_0, window_bounds = array<i64: 8, 784>}, {pipeline_mode = #tpu.pipeline_mode<synchronous>, transform_indices = @transform_1, window_bounds = array<i64: 784, 4>}, {pipeline_mode = #tpu.pipeline_mode<synchronous>, transform_indices = @transform_2, window_bounds = array<i64: 8, 8>}, {transform_indices = @transform_3, window_bounds = array<i64: 8, 1>}]} {
    %c0 = arith.constant 0 : index
    %c0_0 = arith.constant 0 : index
    %0 = vector.load %arg1[%c0, %c0_0] : memref<8x784xbf16, #tpu.memory_space<vmem>>, vector<8x784xbf16>
    %c0_1 = arith.constant 0 : index
    %c0_2 = arith.constant 0 : index
    %1 = vector.load %arg2[%c0_1, %c0_2] : memref<784x4xbf16, #tpu.memory_space<vmem>>, vector<784x4xbf16>
    %cst = arith.constant dense<0.000000e+00> : vector<8x4xf32>
    %2 = tpu.matmul %0, %1, %cst {dimension_numbers = #tpu.dot_dimension_numbers<[1], [0], [0], [1], [0, 0, 1, 1], [], []>} : vector<8x784xbf16>, vector<784x4xbf16>, vector<8x4xf32> -> vector<8x4xf32>
    %c0_3 = arith.constant 0 : index
    %c0_4 = arith.constant 0 : index
    %3 = vector.load %arg3[%c0_3, %c0_4] : memref<8x8xf32, #tpu.memory_space<vmem>>, vector<8x8xf32>
    %4 = vector.extract_strided_slice %3 {offsets = [0, 0], sizes = [1, 4], strides = [1, 1]} : vector<8x8xf32> to vector<1x4xf32>
    %5 = vector.extract_strided_slice %3 {offsets = [1, 0], sizes = [4, 4], strides = [1, 1]} : vector<8x8xf32> to vector<4x4xf32>
    %6 = vector.extract_strided_slice %3 {offsets = [5, 0], sizes = [1, 4], strides = [1, 1]} : vector<8x8xf32> to vector<1x4xf32>
    %7 = vector.extract_strided_slice %3 {offsets = [6, 0], sizes = [1, 4], strides = [1, 1]} : vector<8x8xf32> to vector<1x4xf32>
    %8 = vector.extract_strided_slice %3 {offsets = [7, 0], sizes = [1, 1], strides = [1, 1]} : vector<8x8xf32> to vector<1x1xf32>
    %9 = vector.broadcast %4 : vector<1x4xf32> to vector<8x4xf32>
    %10 = arith.addf %2, %9 : vector<8x4xf32>
    %11 = arith.negf %10 : vector<8x4xf32>
    %12 = math.exp %11 : vector<8x4xf32>
    %cst_5 = arith.constant 1.000000e+00 : f32
    %13 = vector.broadcast %cst_5 : f32 to vector<8x4xf32>
    %14 = arith.addf %13, %12 : vector<8x4xf32>
    %15 = arith.divf %13, %14 : vector<8x4xf32>
    %16 = vector.extract_strided_slice %15 {offsets = [0, 0], sizes = [8, 1], strides = [1, 1]} : vector<8x4xf32> to vector<8x1xf32>
    %17 = vector.extract_strided_slice %5 {offsets = [0, 0], sizes = [1, 4], strides = [1, 1]} : vector<4x4xf32> to vector<1x4xf32>
    %18 = vector.broadcast %16 : vector<8x1xf32> to vector<8x4xf32>
    %19 = vector.broadcast %17 : vector<1x4xf32> to vector<8x4xf32>
    %20 = arith.mulf %18, %19 : vector<8x4xf32>
    %21 = vector.extract_strided_slice %15 {offsets = [0, 1], sizes = [8, 1], strides = [1, 1]} : vector<8x4xf32> to vector<8x1xf32>
    %22 = vector.extract_strided_slice %5 {offsets = [1, 0], sizes = [1, 4], strides = [1, 1]} : vector<4x4xf32> to vector<1x4xf32>
    %23 = vector.broadcast %21 : vector<8x1xf32> to vector<8x4xf32>
    %24 = vector.broadcast %22 : vector<1x4xf32> to vector<8x4xf32>
    %25 = arith.mulf %23, %24 : vector<8x4xf32>
    %26 = arith.addf %20, %25 : vector<8x4xf32>
    %27 = vector.extract_strided_slice %15 {offsets = [0, 2], sizes = [8, 1], strides = [1, 1]} : vector<8x4xf32> to vector<8x1xf32>
    %28 = vector.extract_strided_slice %5 {offsets = [2, 0], sizes = [1, 4], strides = [1, 1]} : vector<4x4xf32> to vector<1x4xf32>
    %29 = vector.broadcast %27 : vector<8x1xf32> to vector<8x4xf32>
    %30 = vector.broadcast %28 : vector<1x4xf32> to vector<8x4xf32>
    %31 = arith.mulf %29, %30 : vector<8x4xf32>
    %32 = arith.addf %26, %31 : vector<8x4xf32>
    %33 = vector.extract_strided_slice %15 {offsets = [0, 3], sizes = [8, 1], strides = [1, 1]} : vector<8x4xf32> to vector<8x1xf32>
    %34 = vector.extract_strided_slice %5 {offsets = [3, 0], sizes = [1, 4], strides = [1, 1]} : vector<4x4xf32> to vector<1x4xf32>
    %35 = vector.broadcast %33 : vector<8x1xf32> to vector<8x4xf32>
    %36 = vector.broadcast %34 : vector<1x4xf32> to vector<8x4xf32>
    %37 = arith.mulf %35, %36 : vector<8x4xf32>
    %38 = arith.addf %32, %37 : vector<8x4xf32>
    %39 = vector.broadcast %6 : vector<1x4xf32> to vector<8x4xf32>
    %40 = arith.addf %38, %39 : vector<8x4xf32>
    %41 = arith.negf %40 : vector<8x4xf32>
    %42 = math.exp %41 : vector<8x4xf32>
    %cst_6 = arith.constant 1.000000e+00 : f32
    %43 = vector.broadcast %cst_6 : f32 to vector<8x4xf32>
    %44 = arith.addf %43, %42 : vector<8x4xf32>
    %45 = arith.divf %43, %44 : vector<8x4xf32>
    %46 = vector.extract_strided_slice %45 {offsets = [0, 0], sizes = [8, 1], strides = [1, 1]} : vector<8x4xf32> to vector<8x1xf32>
    %47 = vector.extract_strided_slice %7 {offsets = [0, 0], sizes = [1, 1], strides = [1, 1]} : vector<1x4xf32> to vector<1x1xf32>
    %48 = vector.broadcast %47 : vector<1x1xf32> to vector<8x1xf32>
    %49 = arith.mulf %46, %48 : vector<8x1xf32>
    %50 = vector.extract_strided_slice %45 {offsets = [0, 1], sizes = [8, 1], strides = [1, 1]} : vector<8x4xf32> to vector<8x1xf32>
    %51 = vector.extract_strided_slice %7 {offsets = [0, 1], sizes = [1, 1], strides = [1, 1]} : vector<1x4xf32> to vector<1x1xf32>
    %52 = vector.broadcast %51 : vector<1x1xf32> to vector<8x1xf32>
    %53 = arith.mulf %50, %52 : vector<8x1xf32>
    %54 = arith.addf %49, %53 : vector<8x1xf32>
    %55 = vector.extract_strided_slice %45 {offsets = [0, 2], sizes = [8, 1], strides = [1, 1]} : vector<8x4xf32> to vector<8x1xf32>
    %56 = vector.extract_strided_slice %7 {offsets = [0, 2], sizes = [1, 1], strides = [1, 1]} : vector<1x4xf32> to vector<1x1xf32>
    %57 = vector.broadcast %56 : vector<1x1xf32> to vector<8x1xf32>
    %58 = arith.mulf %55, %57 : vector<8x1xf32>
    %59 = arith.addf %54, %58 : vector<8x1xf32>
    %60 = vector.extract_strided_slice %45 {offsets = [0, 3], sizes = [8, 1], strides = [1, 1]} : vector<8x4xf32> to vector<8x1xf32>
    %61 = vector.extract_strided_slice %7 {offsets = [0, 3], sizes = [1, 1], strides = [1, 1]} : vector<1x4xf32> to vector<1x1xf32>
    %62 = vector.broadcast %61 : vector<1x1xf32> to vector<8x1xf32>
    %63 = arith.mulf %60, %62 : vector<8x1xf32>
    %64 = arith.addf %59, %63 : vector<8x1xf32>
    %65 = vector.broadcast %8 : vector<1x1xf32> to vector<8x1xf32>
    %66 = arith.addf %64, %65 : vector<8x1xf32>
    %67 = arith.negf %66 : vector<8x1xf32>
    %68 = math.exp %67 : vector<8x1xf32>
    %cst_7 = arith.constant 1.000000e+00 : f32
    %69 = vector.broadcast %cst_7 : f32 to vector<8x1xf32>
    %70 = arith.addf %69, %68 : vector<8x1xf32>
    %71 = arith.divf %69, %70 : vector<8x1xf32>
    %c0_8 = arith.constant 0 : index
    %c0_9 = arith.constant 0 : index
    %72 = vector.load %arg4[%c0_8, %c0_9] : memref<8x1xf32, #tpu.memory_space<vmem>>, vector<8x1xf32>
    tpu.vector_store %arg4[%c0_8, %c0_9], %71 {strides = array<i32>} : memref<8x1xf32, #tpu.memory_space<vmem>>, vector<8x1xf32>,
    return
  }
  func.func @transform_0(%arg0: i32) -> (i32, i32) {
    %c0_i32 = arith.constant 0 : i32
    %c0_i32_0 = arith.constant 0 : i32
    return %arg0, %c0_i32 : i32, i32
  }
  func.func @transform_1(%arg0: i32) -> (i32, i32) {
    %c0_i32 = arith.constant 0 : i32
    %c0_i32_0 = arith.constant 0 : i32
    %c0_i32_1 = arith.constant 0 : i32
    return %c0_i32, %c0_i32_0 : i32, i32
  }
  func.func @transform_2(%arg0: i32) -> (i32, i32) {
    %c0_i32 = arith.constant 0 : i32
    %c0_i32_0 = arith.constant 0 : i32
    %c0_i32_1 = arith.constant 0 : i32
    return %c0_i32, %c0_i32_0 : i32, i32
  }
  func.func @transform_3(%arg0: i32) -> (i32, i32) {
    %c0_i32 = arith.constant 0 : i32
    %c0_i32_0 = arith.constant 0 : i32
    return %arg0, %c0_i32 : i32, i32
  }
}

</mosaic_0001>

<bundles_post_ra>
// kernel: tpu_custom_call.1
= control target key start
LH: loop header
LB: loop body
LE: loop exit
PB: predicated region body
PF: predicated region fallthrough
CT: control target
= control target key end

     0   :  { %vm437_vm0 = vcmask 130048   ;;  %s921_s11 = smov 126   ;;  %vm636_vm11 = vcmask 7168   ;;  %s1117_s1 = inlined_call_operand.vmem [shape: bf16[784,4], index: 1, kind: input, shape index: {}]   ;;  %s1118_s0 = inlined_call_operand.vmem [shape: bf16[8,784], index: 0, kind: input, shape index: {}]   ;;  %s1119_s2 = inlined_call_operand.vmem [shape: f32[8,8], index: 2, kind: input, shape index: {}]   ;;  %s1120_s3 = inlined_call_operand.vmem [shape: f32[8,1], index: 3, kind: output, shape index: {}]  }
   0x1   :  { %v849_v0 = vld [vmem:[%s1117_s1 + $0x38] sm:$0xff]  ;;  %v848_v3 = vld [vmem:[%s1117_s1 + $0x30] sm:$0xff]  ;;  %v847_v8 = vld [vmem:[%s1117_s1 + $0x28] sm:$0xff] }
   0x2   :  { %v857_v1 = vld [vmem:[%s1117_s1 + $0x78] sm:$0xff]  ;;  %441 = vmatpush.bf16.msra.mxu0 %v849_v0  ;;  %v856_v4 = vld [vmem:[%s1117_s1 + $0x70] sm:$0xff]  ;;  %v855_v9 = vld [vmem:[%s1117_s1 + $0x68] sm:$0xff] }
   0x3   :  { %v865_v2 = vld [vmem:[%s1117_s1 + $0xb8] sm:$0xff]  ;;  %454 = vmatpush.bf16.msra.mxu1 %v857_v1  ;;  %v864_v5 = vld [vmem:[%s1117_s1 + $0xb0] sm:$0xff]  ;;  %v863_v10 = vld [vmem:[%s1117_s1 + $0xa8] sm:$0xff] }
   0x4   :  { %467 = vmatpush.bf16.msra.mxu2 %v865_v2  ;;  %v873_v6 = vld [vmem:[%s1117_s1 + $0xf8] sm:$0xff]  ;;  %v872_v7 = vld [vmem:[%s1117_s1 + $0xf0] sm:$0xff]  ;;  %v871_v11 = vld [vmem:[%s1117_s1 + $0xe8] sm:$0xff] }
   0x5   :  { %480 = vmatpush.bf16.msra.mxu3 %v873_v6  ;;  %v846_v12 = vld [vmem:[%s1117_s1 + $0x20] sm:$0xff]  ;;  %v845_v16 = vld [vmem:[%s1117_s1 + $0x18] sm:$0xff]  ;;  %v844_v20 = vld [vmem:[%s1117_s1 + $0x10] sm:$0xff] }
   0x6   :  { %442 = vmatpush.bf16.msra.mxu0 %v848_v3  ;;  %v854_v13 = vld [vmem:[%s1117_s1 + $0x60] sm:$0xff]  ;;  %v853_v17 = vld [vmem:[%s1117_s1 + $0x58] sm:$0xff]  ;;  %v852_v21 = vld [vmem:[%s1117_s1 + $0x50] sm:$0xff] }
   0x7   :  { %455 = vmatpush.bf16.msra.mxu1 %v856_v4  ;;  %v862_v14 = vld [vmem:[%s1117_s1 + $0xa0] sm:$0xff]  ;;  %v861_v18 = vld [vmem:[%s1117_s1 + $0x98] sm:$0xff]  ;;  %v860_v22 = vld [vmem:[%s1117_s1 + $0x90] sm:$0xff] }
   0x8   :  { %468 = vmatpush.bf16.msra.mxu2 %v864_v5  ;;  %v870_v15 = vld [vmem:[%s1117_s1 + $0xe0] sm:$0xff]  ;;  %v869_v19 = vld [vmem:[%s1117_s1 + $0xd8] sm:$0xff]  ;;  %v868_v23 = vld [vmem:[%s1117_s1 + $0xd0] sm:$0xff] }
   0x9   :  { %481 = vmatpush.bf16.msra.mxu3 %v872_v7  ;;  %v843_v24 = vld [vmem:[%s1117_s1 + $0x8] sm:$0xff]  ;;  %v15_v26 = vld [vmem:[%s1118_s0] sm:$0xff]  ;;  %v881_v34 = vld [vmem:[%s1117_s1 + $0x138] sm:$0xff] }
   0xa   :  { %443 = vmatpush.bf16.msra.mxu0 %v847_v8  ;;  %v851_v25 = vld [vmem:[%s1117_s1 + $0x48] sm:$0xff]  ;;  %v123_v29 = vunpack.c.l.b16 %v15_v26  ;;  %v124_v31 = vunpack.c.h.b16 %v15_v26  ;;  %v842_v32 = vld [vmem:[%s1117_s1] sm:$0xff]  ;;  %v889_v35 = vld [vmem:[%s1117_s1 + $0x178] sm:$0xff] }
   0xb   :  { %456 = vmatpush.bf16.msra.mxu1 %v855_v9  ;;  %v859_v27 = vld [vmem:[%s1117_s1 + $0x88] sm:$0xff]  ;;  %v850_v33 = vld [vmem:[%s1117_s1 + $0x40] sm:$0xff]  ;;  %v880_v43 = vld [vmem:[%s1117_s1 + $0x130] sm:$0xff] }
   0xc   :  { %469 = vmatpush.bf16.msra.mxu2 %v863_v10  ;;  %v16_v28 = vld [vmem:[%s1118_s0 + $0x8] sm:$0xff]  ;;  %v858_v36 = vld [vmem:[%s1117_s1 + $0x80] sm:$0xff]  ;;  %v130_v38 = vpack.c.b16 %v123_v29, %v123_v29  ;;  %v131_v39 = vpack.c.b16 %v124_v31, %v124_v31  ;;  %v888_v44 = vld [vmem:[%s1117_s1 + $0x170] sm:$0xff] }
   0xd   :  { %482 = vmatpush.bf16.msra.mxu3 %v871_v11  ;;  %v867_v30 = vld [vmem:[%s1117_s1 + $0xc8] sm:$0xff]  ;;  %v125_v37 = vunpack.c.l.b16 %v16_v28  ;;  %v126_v40 = vunpack.c.h.b16 %v16_v28  ;;  %v866_v41 = vld [vmem:[%s1117_s1 + $0xc0] sm:$0xff]  ;;  %v18_v51 = vld [vmem:[%s1118_s0 + $0x18] sm:$0xf] }
   0xe   :  { %444 = vmatpush.bf16.msra.mxu0 %v846_v12  ;;  %v890_v42 = vld [vmem:[%s1117_s1 + $0x180] sm:$0xff]  ;;  %v879_v47 = vld [vmem:[%s1117_s1 + $0x128] sm:$0xff]  ;;  %v877_v52 = vld [vmem:[%s1117_s1 + $0x118] sm:$0xff]  ;;  %v129_v54 = vunpack.c.l.b16 %v18_v51  ;;  %v915_v12 = vmov 2  }
   0xf   :  { %457 = vmatpush.bf16.msra.mxu1 %v854_v13  ;;  %v132_v45 = vpack.c.b16 %v125_v37, %v125_v37  ;;  %v133_v46 = vpack.c.b16 %v126_v40, %v126_v40  ;;  %v887_v48 = vld [vmem:[%s1117_s1 + $0x168] sm:$0xff]  ;;  %v878_v49 = vld [vmem:[%s1117_s1 + $0x120] sm:$0xff]  ;;  %v885_v53 = vld [vmem:[%s1117_s1 + $0x158] sm:$0xff]  ;;  %900 = vset.pattern.permute.xlu1 %v915_v12  ;;  %v916_v13 = vmov 0  }
  0x10   :  { %470 = vmatpush.bf16.msra.mxu2 %v862_v14  ;;  %v886_v50 = vld [vmem:[%s1117_s1 + $0x160] sm:$0xff]  ;;  %v876_v55 = vld [vmem:[%s1117_s1 + $0x110] sm:$0xff]  ;;  %v136_v57 = vpack.c.b16 %v129_v54, %v129_v54  ;;  %v875_v58 = vld [vmem:[%s1117_s1 + $0x108] sm:$0xff]  ;;  %898 = vset.pattern.permute.xlu0 %v916_v13 }
  0x11   :  { %483 = vmatpush.bf16.msra.mxu3 %v870_v15  ;;  %v884_v56 = vld [vmem:[%s1117_s1 + $0x150] sm:$0xff]  ;;  %v883_v59 = vld [vmem:[%s1117_s1 + $0x148] sm:$0xff]  ;;  %v874_v63 = vld [vmem:[%s1117_s1 + $0x100] sm:$0xff] }
  0x12   :  { %445 = vmatpush.bf16.msra.mxu0 %v845_v16  ;;  %v17_v60 = vld [vmem:[%s1118_s0 + $0x10] sm:$0xff]  ;;  %v882_v0 = vld [vmem:[%s1117_s1 + $0x140] sm:$0xff]  ;;  %s919_s1 = smov 125  }
  0x13   :  { %458 = vmatpush.bf16.msra.mxu1 %v853_v17  ;;  %v127_v61 = vunpack.c.l.b16 %v17_v60  ;;  %v128_v62 = vunpack.c.h.b16 %v17_v60  ;;  %v1104_v7 = vld [vmem:[%s1119_s2] sm:$0xff]  ;;  %s920_s2 = smov 127  }
  0x14   :  { %471 = vmatpush.bf16.msra.mxu2 %v861_v18  ;;  %v118_v10 = vperm.slane %v1104_v7, 0 }
  0x15   :  { %484 = vmatpush.bf16.msra.mxu3 %v869_v19  ;;  %v134_v1 = vpack.c.b16 %v127_v61, %v127_v61  ;;  %v135_v2 = vpack.c.b16 %v128_v62, %v128_v62 }
  0x16   :  { %446 = vmatpush.bf16.msra.mxu0 %v844_v20 }
  0x17   :  { %459 = vmatpush.bf16.msra.mxu1 %v852_v21 }
  0x18   :  { %472 = vmatpush.bf16.msra.mxu2 %v860_v22 }
  0x19   :  { %485 = vmatpush.bf16.msra.mxu3 %v868_v23 }
  0x1a   :  { %447 = vmatpush.bf16.msra.mxu0 %v843_v24 }
  0x1b   :  { %460 = vmatpush.bf16.msra.mxu1 %v851_v25 }
  0x1c   :  { %473 = vmatpush.bf16.msra.mxu2 %v859_v27 }
  0x1d   :  { %486 = vmatpush.bf16.msra.mxu3 %v867_v30 }
  0x1e   :  { %448 = vmatpush.bf16.msra.mxu0 %v842_v32 }
  0x1f   :  { %461 = vmatpush.bf16.msra.mxu1 %v850_v33 }
  0x20   :  { %474 = vmatpush.bf16.msra.mxu2 %v858_v36 }
  0x21   :  { %449 = vmatmul.bf16.vlgmr.msra.gmra.mxu0 %v130_v38  ;;  %487 = vmatpush.bf16.msra.mxu3 %v866_v41  ;;  %v917_v41 = vmov 3  }
  0x22   :  { %493 = vmatpush.bf16.msrb.mxu0 %v881_v34  ;;  %462 = vmatmul.bf16.vlgmr.msra.gmra.mxu1 %v131_v39 }
  0x23   :  { %506 = vmatpush.bf16.msrb.mxu1 %v889_v35  ;;  %475 = vmatmul.bf16.vlgmr.msra.gmra.mxu2 %v132_v45  ;;  %v556_v45 = vperm.slane %v1104_v7, 1 }
  0x24   :  { %526 = vmatpush.bf16.msrb.mxu2 %v890_v42  ;;  %488 = vmatmul.bf16.vlgmr.msra.gmra.mxu3 %v133_v46  ;;  %v918_v42 = vmov 1   ;;  %v562_v46 = vperm.slane %v1104_v7, 2 }
  0x26   :  { %494 = vmatpush.bf16.msrb.mxu0 %v880_v43 }
  0x27   :  { %507 = vmatpush.bf16.msrb.mxu1 %v888_v44 }
  0x2a   :  { %495 = vmatpush.bf16.msrb.mxu0 %v879_v47  ;;  %v569_v47 = vperm.slane %v1104_v7, 3 }
  0x2b   :  { %508 = vmatpush.bf16.msrb.mxu1 %v887_v48 }
  0x2e   :  { %496 = vmatpush.bf16.msrb.mxu0 %v878_v49 }
  0x2f   :  { %509 = vmatpush.bf16.msrb.mxu1 %v886_v50  ;;  %v576_v50 = vperm.slane %v1104_v7, 4 }
  0x32   :  { %497 = vmatpush.bf16.msrb.mxu0 %v877_v52 }
  0x33   :  { %510 = vmatpush.bf16.msrb.mxu1 %v885_v53  ;;  %838 = vmatmul.msk.bf16.vlgmr.msrb.gmra.mxu2 %vm437_vm0, %v136_v57 }
  0x36   :  { %498 = vmatpush.bf16.msrb.mxu0 %v876_v55 }
  0x37   :  { %511 = vmatpush.bf16.msrb.mxu1 %v884_v56  ;;  %v579_v56 = vperm.slane %v1104_v7, 5 }
  0x3a   :  { %499 = vmatpush.bf16.msrb.mxu0 %v875_v58 }
  0x3b   :  { %512 = vmatpush.bf16.msrb.mxu1 %v883_v59 }
  0x3e   :  { %500 = vmatpush.bf16.msrb.mxu0 %v874_v63 }
  0x3f   :  { %513 = vmatpush.bf16.msrb.mxu1 %v882_v0 }
  0x41   :  { %501 = vmatmul.bf16.vlgmr.msrb.gmra.mxu0 %v134_v1 }
  0x42   :  { %514 = vmatmul.bf16.vlgmr.msrb.gmra.mxu1 %v135_v2 }
  0x9e   :  { %v450_v3 = vpop.f32.mrf.mxu0 }
  0x9f   :  { %v463_v4 = vpop.f32.mrf.mxu1  ;;  %v451_v11 = vadd.f32 %v450_v3, %v118_v10 }
  0xa1   :  { %v464_v16 = vadd.f32 %v463_v4, %v451_v11 }
  0xa6   :  { %v452_v5 = vpop.f32.mrf.mxu0  ;;  %v476_v8 = vpop.f32.mrf.mxu2 }
  0xa7   :  { %v465_v6 = vpop.f32.mrf.mxu1  ;;  %v489_v9 = vpop.f32.mrf.mxu3  ;;  %v477_v17 = vadd.f32 %v476_v8, %v464_v16  ;;  %v615_v16 = vperm.slane %v1104_v7, 7 }
  0xa8   :  { %v600_v6 = vperm.slane %v1104_v7, 6 }
  0xa9   :  { %v490_v19 = vadd.f32 %v489_v9, %v477_v17 }
  0xae   :  { %v478_v14 = vpop.f32.mrf.mxu2 }
  0xaf   :  { %v491_v15 = vpop.f32.mrf.mxu3 }
  0xb6   :  { %v528_v18 = vpop.f32.mrf.mxu2 }
  0xbe   :  { %v502_v20 = vpop.f32.mrf.mxu0  ;;  %v530_v24 = vpop.f32.mrf.mxu2 }
  0xbf   :  { %v515_v21 = vpop.f32.mrf.mxu1  ;;  %v503_v22 = vadd.f32 %v502_v20, %v490_v19 }
  0xc1   :  { %v516_v23 = vadd.f32 %v515_v21, %v503_v22 }
  0xc3   :  { %v529_v25 = vadd.f32 %v528_v18, %v516_v23 }
  0xc5   :  { %v839_v26 = vmul.f32 -1.442695, %v529_v25 }
  0xc6   :  { %v504_v27 = vpop.f32.mrf.mxu0 }
  0xc7   :  { %v517_v28 = vpop.f32.mrf.mxu1  ;;  %903 = vpow2.f32 %v839_v26 }
  0xcd   :  { %v904_v29 = vpop.eup %903 }
  0xce   :  { %v535_v30 = vadd.f32 1.0, %v904_v29 }
  0xd0   :  { %905 = vrcp.f32 %v535_v30  ;;  %v547_v34 = vand.u32 2147483648, %v535_v30  ;;  %v545_v36 = vand.u32 2147483647, %v535_v30  ;;  %vm541_vm2 = vweird.f32 %v535_v30 }
  0xd2   :  { %v548_v38 = vor.u32 1.1754944e-38, %v547_v34  ;;  %vm546_vm4 = vcmp.eq.f32.partialorder %v545_v36, 8.507059e+37 }
  0xd6   :  { %v906_v31 = vpop.eup %905 }
  0xd7   :  { %v537_v32 = vmul.f32 %v906_v31, %v535_v30  ;;  %vm542_vm1 = vweird.f32 %v906_v31 }
  0xd8   :  { %vm543_vm3 = vmor %vm541_vm2, %vm542_vm1 }
  0xd9   :  { %v538_v33 = vsub.f32 1.0, %v537_v32 }
  0xdb   :  { %v539_v35 = vmul.f32 %v906_v31, %v538_v33 }
  0xdd   :  { %v540_v37 = vadd.f32 %v906_v31, %v539_v35 }
  0xdf   :  { %v544_v39 = vsel %vm543_vm3, %v906_v31, %v540_v37 }
  0xe0   :  { %v549_v40 = vsel %vm546_vm4, %v548_v38, %v544_v39 }
  0xe1   :  { %566 = vperm.xlu1 %900, %v549_v40   ;;  %553 = vperm.xlu0 %898, %v549_v40  }
  0xe9   :  { %901 = vset.pattern.permute.xlu1 %v917_v41  ;;  %899 = vset.pattern.permute.xlu0 %v918_v42 }
  0xea   :  { %573 = vperm.xlu1 %901, %v549_v40   ;;  %559 = vperm.xlu0 %899, %v549_v40  }
  0xf2   :  { %902 = vset.pattern.permute.xlu0 %v917_v41 }
 0x153   :  { %v554_v43 = vpop.permute.xlu0 %553  ;;  %v567_v44 = vpop.permute.xlu1 %566 }
 0x154   :  { %v557_v49 = vmul.f32 %v556_v45, %v554_v43  ;;  %v570_v53 = vmul.f32 %v569_v47, %v567_v44 }
 0x15c   :  { %v560_v48 = vpop.permute.xlu0 %559  ;;  %v574_v52 = vpop.permute.xlu1 %573 }
 0x15d   :  { %v563_v51 = vmul.f32 %v562_v46, %v560_v48  ;;  %v577_v55 = vmul.f32 %v576_v50, %v574_v52 }
 0x15f   :  { %v564_v54 = vadd.f32 %v563_v51, %v557_v49 }
 0x161   :  { %v571_v57 = vadd.f32 %v570_v53, %v564_v54 }
 0x163   :  { %v578_v58 = vadd.f32 %v577_v55, %v571_v57 }
 0x165   :  { %v580_v59 = vadd.f32 %v579_v56, %v578_v58 }
 0x167   :  { %v840_v60 = vmul.f32 -1.442695, %v580_v59 }
 0x169   :  { %907 = vpow2.f32 %v840_v60 }
 0x16f   :  { %v908_v61 = vpop.eup %907 }
 0x170   :  { %v584_v62 = vadd.f32 1.0, %v908_v61 }
 0x172   :  { %909 = vrcp.f32 %v584_v62  ;;  %v596_v2 = vand.u32 2147483648, %v584_v62  ;;  %v594_v4 = vand.u32 2147483647, %v584_v62  ;;  %vm590_vm6 = vweird.f32 %v584_v62 }
 0x174   :  { %v597_v8 = vor.u32 1.1754944e-38, %v596_v2  ;;  %vm595_vm8 = vcmp.eq.f32.partialorder %v594_v4, 8.507059e+37 }
 0x178   :  { %v910_v63 = vpop.eup %909 }
 0x179   :  { %v586_v0 = vmul.f32 %v910_v63, %v584_v62  ;;  %vm591_vm5 = vweird.f32 %v910_v63 }
 0x17a   :  { %vm592_vm7 = vmor %vm590_vm6, %vm591_vm5 }
 0x17b   :  { %v587_v1 = vsub.f32 1.0, %v586_v0 }
 0x17d   :  { %v588_v3 = vmul.f32 %v910_v63, %v587_v1 }
 0x17f   :  { %v589_v5 = vadd.f32 %v910_v63, %v588_v3 }
 0x181   :  { %v593_v9 = vsel %vm592_vm7, %v910_v63, %v589_v5 }
 0x182   :  { %v598_v10 = vsel %vm595_vm8, %v597_v8, %v593_v9 }
 0x183   :  { %v601_v11 = vmul.f32 %v600_v6, %v598_v10 }
 0x185   :  { %611 = vrot.lane.b32.xlu1 %v601_v11, %s919_s1  ;;  %603 = vrot.lane.b32.xlu2 %v601_v11, %s920_s2 }
 0x18d   :  { %607 = vrot.lane.b32.xlu2 %v601_v11, %s921_s11 }
 0x1df   :  { %v604_v12 = vpop.permute.xlu2 %603 }
 0x1e0   :  { %v606_v14 = vadd.f32 %v604_v12, %v601_v11 }
 0x1e7   :  { %v608_v13 = vpop.permute.xlu2 %607 }
 0x1e8   :  { %v610_v15 = vadd.f32 %v608_v13, %v606_v14 }
 0x1f7   :  { %v612_v17 = vpop.permute.xlu1 %611 }
 0x1f8   :  { %v614_v18 = vadd.f32 %v612_v17, %v610_v15 }
 0x1fa   :  { %v616_v19 = vadd.f32 %v615_v16, %v614_v18 }
 0x1fc   :  { %v841_v20 = vmul.f32 -1.442695, %v616_v19 }
 0x1fe   :  { %911 = vpow2.f32 %v841_v20 }
 0x204   :  { %v912_v21 = vpop.eup %911 }
 0x205   :  { %v620_v22 = vadd.f32 1.0, %v912_v21 }
 0x207   :  { %913 = vrcp.f32 %v620_v22  ;;  %v632_v26 = vand.u32 2147483648, %v620_v22  ;;  %v630_v28 = vand.u32 2147483647, %v620_v22  ;;  %vm626_vm10 = vweird.f32 %v620_v22 }
 0x209   :  { %v633_v7 = vor.u32 1.1754944e-38, %v632_v26  ;;  %vm631_vm13 = vcmp.eq.f32.partialorder %v630_v28, 8.507059e+37 }
 0x20d   :  { %v914_v23 = vpop.eup %913 }
 0x20e   :  { %v622_v24 = vmul.f32 %v914_v23, %v620_v22  ;;  %vm627_vm9 = vweird.f32 %v914_v23 }
 0x20f   :  { %vm628_vm12 = vmor %vm626_vm10, %vm627_vm9 }
 0x210   :  { %v623_v25 = vsub.f32 1.0, %v622_v24 }
 0x212   :  { %v624_v27 = vmul.f32 %v914_v23, %v623_v25 }
 0x214   :  { %v625_v29 = vadd.f32 %v914_v23, %v624_v27 }
 0x216   :  { %v629_v30 = vsel %vm628_vm12, %v914_v23, %v625_v29 }
 0x217   :  { %v634_v31 = vsel %vm631_vm13, %v633_v7, %v629_v30 }
 0x218   :  { %637 = vst.msk [vmem:[%s1120_s3] sm:$0xff] %vm636_vm11, %v634_v31 }

</bundles_post_ra>
